<compile_context>
chip_gen: v6e
topology: v6e:2x2x1
jax: 0.10.0
libtpu: 0.0.40
codegen_flags: <defaults>
</compile_context>

<pallas_src>
import functools

import jax
import jax.numpy as jnp
from jax import lax
from jax.experimental import pallas as pl
from jax.experimental.pallas import tpu as pltpu


# --------------------- single-pass (monolithic block) ---------------------

def _se_kernel(x_ref, w1_ref, w2_ref, o_ref, *, inv_hw):
    x = x_ref[...]                                              # (bb, C, HW)
    # Squeeze: mean over H*W, f32 accumulation, no full-block f32 temp.
    y = jnp.sum(x, axis=-1, dtype=jnp.float32) * inv_hw         # (bb, C)
    # Excitation: Linear -> ReLU -> Linear -> Sigmoid (tiny, hidden under DMA).
    w1 = w1_ref[...].astype(jnp.float32)
    w2 = w2_ref[...].astype(jnp.float32)
    h = jnp.maximum(jnp.dot(y, w1, preferred_element_type=jnp.float32), 0.0)
    s = jax.nn.sigmoid(jnp.dot(h, w2, preferred_element_type=jnp.float32))
    # Scale in the input dtype (halves VALU / vreg pressure for bf16 inputs).
    o_ref[...] = x * s.astype(x.dtype)[:, :, None]


# ------------- two-pass fallback (huge per-sample spatial size) -----------

def _pool_kernel(x_ref, sums_ref, *, hw, thw, masked):
    j = pl.program_id(1)
    x = x_ref[...]                                              # (1, C, thw)
    if masked:
        lane = lax.broadcasted_iota(jnp.int32, x.shape, dimension=2)
        x = jnp.where(j * thw + lane < hw, x, jnp.zeros_like(x))
    part = jnp.sum(x, axis=-1, keepdims=True, dtype=jnp.float32)  # (1, C, 1)

    @pl.when(j == 0)
    def _():
        sums_ref[...] = jnp.zeros_like(sums_ref)

    sums_ref[...] += part


def _scale_kernel(x_ref, g_ref, o_ref):
    x = x_ref[...]                                              # (1, C, thw)
    o_ref[...] = x * g_ref[...].astype(x.dtype)                 # g: (1, C, 1)


# ------------------------------ wrapper ------------------------------------

def _vmem_budget_bytes():
    cap = 64 << 20  # conservative default (v7x VMEM per TensorCore)
    try:
        info = pltpu.get_tpu_info()
        c = getattr(info, "vmem_capacity_bytes", None)
        if c:
            cap = int(c)
    except Exception:
        pass
    return (cap * 3) // 4           # leave ~25% headroom for Mosaic scratch


def _pick_block_batch(batch, bytes_per_sample, target_bytes, min_steps=4):
    """Biggest bb under the per-block byte budget with >= min_steps grid steps."""
    bb_bytes = max(1, target_bytes // max(1, bytes_per_sample))
    bb_steps = max(1, batch // min_steps)
    return max(1, min(batch, bb_bytes, bb_steps))


def se_layer(x, w1, w2, *, target_block_bytes=8 << 20, force_two_pass=False):
    """SELayer forward.

    x:  (B, C, H, W) activations (f32 or bf16; pool/FC/sigmoid always in f32)
    w1: (C, C//r) first FC weight (math layout, no bias)
    w2: (C//r, C) second FC weight (math layout, no bias)
    """
    B, C, H, W = x.shape
    Cr = w1.shape[1]
    HW = H * W
    inv_hw = float(1.0 / HW)
    itemsize = jnp.dtype(x.dtype).itemsize
    bytes_per_sample = C * HW * itemsize
    weight_bytes = (w1.size * jnp.dtype(w1.dtype).itemsize
                    + w2.size * jnp.dtype(w2.dtype).itemsize)
    vmem_budget = _vmem_budget_bytes()

    x_flat = x.reshape(B, C, HW)    # contiguous -> metadata-only reshape

    # Two-pass only when a single-sample monolithic block (double-buffered
    # in + out) would not fit comfortably in VMEM.
    two_pass = force_two_pass or (
        4 * bytes_per_sample + 4 * weight_bytes + (2 << 20) > vmem_budget)

    if not two_pass:
        bb = _pick_block_batch(B, bytes_per_sample, target_block_bytes)
        grid = (pl.cdiv(B, bb),)
        block_bytes = bb * bytes_per_sample
        vmem_limit = int(min(vmem_budget,
                             max(32 << 20,
                                 4 * block_bytes + 4 * weight_bytes + (4 << 20))))
        cost = pl.CostEstimate(
            flops=int(2 * B * C * HW + 4 * B * C * Cr),
            transcendentals=int(B * C),
            bytes_accessed=int(2 * B * C * HW * itemsize + weight_bytes),
        )
        out_flat = pl.pallas_call(
            functools.partial(_se_kernel, inv_hw=inv_hw),
            out_shape=jax.ShapeDtypeStruct((B, C, HW), x.dtype),
            grid=grid,
            in_specs=[
                pl.BlockSpec((bb, C, HW), lambda b: (b, 0, 0)),   # streamed x
                pl.BlockSpec((C, Cr), lambda b: (0, 0)),          # resident w1
                pl.BlockSpec((Cr, C), lambda b: (0, 0)),          # resident w2
            ],
            out_specs=pl.BlockSpec((bb, C, HW), lambda b: (b, 0, 0)),
            compiler_params=pltpu.CompilerParams(
                dimension_semantics=("parallel",),   # batch axis -> megacore
                vmem_limit_bytes=vmem_limit,
            ),
            cost_estimate=cost,
        )(x_flat, w1, w2)
        return out_flat.reshape(B, C, H, W)

    # -------- two-pass: HW-tiled pool, tiny FC in plain JAX, HW-tiled scale ----
    thw = max(128, (target_block_bytes // max(1, C * itemsize)) // 128 * 128)
    if thw >= HW:
        thw = HW                      # full array dim -> exempt from 128 rule
    masked = (HW % thw) != 0
    grid2 = (B, pl.cdiv(HW, thw))
    vmem_limit = int(min(vmem_budget,
                         max(32 << 20, 8 * C * thw * itemsize + (4 << 20))))

    sums = pl.pallas_call(
        functools.partial(_pool_kernel, hw=HW, thw=thw, masked=masked),
        out_shape=jax.ShapeDtypeStruct((B, C, 1), jnp.float32),
        grid=grid2,
        in_specs=[pl.BlockSpec((1, C, thw), lambda b, j: (b, 0, j))],
        out_specs=pl.BlockSpec((1, C, 1), lambda b, j: (b, 0, 0)),
        compiler_params=pltpu.CompilerParams(
            dimension_semantics=("parallel", "arbitrary"),
            vmem_limit_bytes=vmem_limit,
        ),
    )(x_flat)

    # Excitation on (B, C): negligible HBM traffic, keep it in plain JAX.
    y = sums[:, :, 0] * inv_hw
    h = jnp.maximum(y @ w1.astype(jnp.float32), 0.0)
    gate = jax.nn.sigmoid(h @ w2.astype(jnp.float32))[:, :, None]   # (B, C, 1)

    out_flat = pl.pallas_call(
        _scale_kernel,
        out_shape=jax.ShapeDtypeStruct((B, C, HW), x.dtype),
        grid=grid2,
        in_specs=[
            pl.BlockSpec((1, C, thw), lambda b, j: (b, 0, j)),
            pl.BlockSpec((1, C, 1), lambda b, j: (b, 0, 0)),
        ],
        out_specs=pl.BlockSpec((1, C, thw), lambda b, j: (b, 0, j)),
        compiler_params=pltpu.CompilerParams(
            dimension_semantics=("parallel", "parallel"),
            vmem_limit_bytes=vmem_limit,
        ),
    )(x_flat, gate)
    return out_flat.reshape(B, C, H, W)


# ------------------------------- demo / test --------------------------------

def _reference(x, w1, w2):
    y = jnp.mean(x, axis=(2, 3))
    h = jnp.maximum(y @ w1, 0.0)
    s = jax.nn.sigmoid(h @ w2)
    return x * s[:, :, None, None]


def _run_case(key, B, C, H, W, reduction=3, **kwargs):
    Cr = max(1, C // reduction)
    kx, k1, k2 = jax.random.split(key, 3)
    x = jax.random.normal(kx, (B, C, H, W), dtype=jnp.float32)
    w1 = jax.random.normal(k1, (C, Cr), dtype=jnp.float32) * 0.1
    w2 = jax.random.normal(k2, (Cr, C), dtype=jnp.float32) * 0.1
    out = se_layer(x, w1, w2, **kwargs)
    jax.block_until_ready(out)
    ref = _reference(x, w1, w2)
    assert jnp.allclose(out, ref, atol=1e-5, rtol=1e-5), "mismatch vs reference"


if __name__ == "__main__":
    key = jax.random.PRNGKey(0)
    k1, k2, k3 = jax.random.split(key, 3)

    # 1) Main single-pass path (matches nn.Linear(channel, channel // 3)).
    _run_case(k1, B=2, C=4, H=16, W=16)

    # 2) Two-pass fallback path (forced), with non-128-multiple HW -> exercises
    #    HW tiling, ragged-tile masking, and the resident gate broadcast.
    _run_case(k2, B=2, C=4, H=15, W=15,
              force_two_pass=True, target_block_bytes=2048)

    # 3) Single-pass path with a ragged batch grid (bb=2 does not divide B=11).
    _run_case(k3, B=11, C=4, H=8, W=8)

    print("KERNEL_OK")
</pallas_src>

<mosaic_0001>
module attributes {stable_mosaic.version = 11 : i64} {
  func.func @_se_kernel(%arg0: i32, %arg1: memref<1x4x256xf32, #tpu.memory_space<vmem>>, %arg2: memref<4x1xf32, #tpu.memory_space<vmem>>, %arg3: memref<1x4xf32, #tpu.memory_space<vmem>>, %arg4: memref<1x4x256xf32, #tpu.memory_space<vmem>>) attributes {dimension_semantics = [#tpu.dimension_semantics<parallel>], iteration_bounds = array<i64: 2>, scalar_prefetch = 0 : i64, scratch_operands = 0 : i64, tpu.core_type = #tpu.core_type<tc>, window_params = [{transform_indices = @transform_0, window_bounds = array<i64: 1, 4, 256>}, {pipeline_mode = #tpu.pipeline_mode<synchronous>, transform_indices = @transform_1, window_bounds = array<i64: 4, 1>}, {pipeline_mode = #tpu.pipeline_mode<synchronous>, transform_indices = @transform_2, window_bounds = array<i64: 1, 4>}, {transform_indices = @transform_3, window_bounds = array<i64: 1, 4, 256>}]} {
    %c0 = arith.constant 0 : index
    %c0_0 = arith.constant 0 : index
    %c0_1 = arith.constant 0 : index
    %0 = vector.load %arg1[%c0, %c0_0, %c0_1] : memref<1x4x256xf32, #tpu.memory_space<vmem>>, vector<1x4x256xf32>
    %cst = arith.constant dense<0.000000e+00> : vector<1x4xf32>
    %1 = vector.multi_reduction <add>, %0, %cst [2] : vector<1x4x256xf32> to vector<1x4xf32>
    %cst_2 = arith.constant 3.906250e-03 : f32
    %2 = vector.broadcast %cst_2 : f32 to vector<1x4xf32>
    %3 = arith.mulf %1, %2 : vector<1x4xf32>
    %c0_3 = arith.constant 0 : index
    %c0_4 = arith.constant 0 : index
    %4 = vector.load %arg2[%c0_3, %c0_4] : memref<4x1xf32, #tpu.memory_space<vmem>>, vector<4x1xf32>
    %c0_5 = arith.constant 0 : index
    %c0_6 = arith.constant 0 : index
    %5 = vector.load %arg3[%c0_5, %c0_6] : memref<1x4xf32, #tpu.memory_space<vmem>>, vector<1x4xf32>
    %cst_7 = arith.constant dense<0.000000e+00> : vector<1x1xf32>
    %6 = tpu.matmul %3, %4, %cst_7 {dimension_numbers = #tpu.dot_dimension_numbers<[1], [0], [0], [1], [0, 0, 1, 1], [], []>} : vector<1x4xf32>, vector<4x1xf32>, vector<1x1xf32> -> vector<1x1xf32>
    %cst_8 = arith.constant 0.000000e+00 : f32
    %7 = vector.broadcast %cst_8 : f32 to vector<1x1xf32>
    %8 = arith.maximumf %6, %7 : vector<1x1xf32>
    %cst_9 = arith.constant dense<0.000000e+00> : vector<1x4xf32>
    %9 = tpu.matmul %8, %5, %cst_9 {dimension_numbers = #tpu.dot_dimension_numbers<[1], [0], [0], [1], [0, 0, 1, 1], [], []>} : vector<1x1xf32>, vector<1x4xf32>, vector<1x4xf32> -> vector<1x4xf32>
    %10 = arith.negf %9 : vector<1x4xf32>
    %11 = math.exp %10 : vector<1x4xf32>
    %cst_10 = arith.constant 1.000000e+00 : f32
    %12 = vector.broadcast %cst_10 : f32 to vector<1x4xf32>
    %13 = arith.addf %12, %11 : vector<1x4xf32>
    %14 = arith.divf %12, %13 : vector<1x4xf32>
    %15 = vector.shape_cast %14 : vector<1x4xf32> to vector<1x4x1xf32>
    %16 = vector.broadcast %15 : vector<1x4x1xf32> to vector<1x4x256xf32>
    %17 = arith.mulf %0, %16 : vector<1x4x256xf32>
    %c0_11 = arith.constant 0 : index
    %c0_12 = arith.constant 0 : index
    %c0_13 = arith.constant 0 : index
    %18 = vector.load %arg4[%c0_11, %c0_12, %c0_13] : memref<1x4x256xf32, #tpu.memory_space<vmem>>, vector<1x4x256xf32>
    tpu.vector_store %arg4[%c0_11, %c0_12, %c0_13], %17 {strides = array<i32>} : memref<1x4x256xf32, #tpu.memory_space<vmem>>, vector<1x4x256xf32>,
    return
  }
  func.func @transform_0(%arg0: i32) -> (i32, i32, i32) {
    %c0_i32 = arith.constant 0 : i32
    %c0_i32_0 = arith.constant 0 : i32
    %c0_i32_1 = arith.constant 0 : i32
    return %arg0, %c0_i32, %c0_i32_0 : i32, i32, i32
  }
  func.func @transform_1(%arg0: i32) -> (i32, i32) {
    %c0_i32 = arith.constant 0 : i32
    %c0_i32_0 = arith.constant 0 : i32
    %c0_i32_1 = arith.constant 0 : i32
    return %c0_i32, %c0_i32_0 : i32, i32
  }
  func.func @transform_2(%arg0: i32) -> (i32, i32) {
    %c0_i32 = arith.constant 0 : i32
    %c0_i32_0 = arith.constant 0 : i32
    %c0_i32_1 = arith.constant 0 : i32
    return %c0_i32, %c0_i32_0 : i32, i32
  }
  func.func @transform_3(%arg0: i32) -> (i32, i32, i32) {
    %c0_i32 = arith.constant 0 : i32
    %c0_i32_0 = arith.constant 0 : i32
    %c0_i32_1 = arith.constant 0 : i32
    return %arg0, %c0_i32, %c0_i32_0 : i32, i32, i32
  }
}

</mosaic_0001>

<bundles_post_ra>
// kernel: tpu_custom_call.1
= control target key start
LH: loop header
LB: loop body
LE: loop exit
PB: predicated region body
PF: predicated region fallthrough
CT: control target
= control target key end

     0   :  { %8 = vsyncpa [#allocation3], 0  ;;  %s830_s0 = inlined_call_operand.hbm [shape: f32[2,4,256], index: 0, kind: input, shape index: {}]   ;;  %s831_s1 = inlined_call_operand.vmem [shape: f32[4,1], index: 1, kind: input, shape index: {}]   ;;  %s832_s2 = inlined_call_operand.vmem [shape: f32[1,4], index: 2, kind: input, shape index: {}]   ;;  %s833_s3 = inlined_call_operand.hbm [shape: f32[2,4,256], index: 3, kind: output, shape index: {}]  }
   0x1   :  { %10 = vsyncpa [#allocation3 + $0x1], 0 }
   0x2   :  { %11 = vsyncpa [#allocation4], 0 }
   0x3   :  { %13 = vsyncpa [#allocation4 + $0x1], 0  ;;  %s679_s12 = smov 0   ;;  %s681_s13 = smov 0  }
   0x4   :  { %s683_s14 = smov 0   ;;  %s685_s15 = smov 0  }
   0x5 LB: > { %s700_s16 = sadd.s32 4294967295, %s652_s15   ;;  %s471_s17 = sadd.s32 4294967294, %s652_s15   ;;  %s652_s15 = sphi %s685_s15, %s850_s15   ;;  %s648_s14 = sphi %s683_s14, %s849_s14   ;;  %s644_s13 = sphi %s681_s13, %s848_s13   ;;  %s640_s12 = sphi %s679_s12, %s847_s12  }
   0x6   : > { %s704_s18 = sadd.s32 1, %s652_s15   ;;  %s26_s19 = sadd.s32 1, %s648_s14 }
   0x7   : > { %s23_s20 = ssub.s32 %s652_s15, %s704_s18  ;;  %p33_p0 = scmp.ne.s32.totalorder %s648_s14, %s644_s13 }
   0x8   : > { %p24_p1 = scmp.eq.s32.totalorder %s23_s20, 0  ;;  %p34_p2 = scmp.eq.s32.totalorder %s652_s15, 0 }
   0x9   : > { %p39_p3 = scmp.ne.s32.totalorder %s644_s13, %s640_s12  ;;  %p40_p4 = scmp.eq.s32.totalorder %s700_s16, 0 }
   0xa   : > { %s716_s21 = scalar_select %p24_p1, %s648_s14, %s26_s19  }
   0xb   : > { %p718_p5 = por %p34_p2, %p33_p0  ;;  %p722_p6 = por %p40_p4, %p39_p3 }
   0xc   : > { %p105_p7 = scmp.eq.s32.totalorder %s700_s16, 1  ;;  %p111_p8 = scmp.eq.s32.totalorder %s471_s17, 1 }
   0xd   : > { %s837_s23 = scalar_select %p722_p6, 1, 0 }
   0xe   : > { %p518_p10 = scmp.lt.s32.totalorder %s652_s15, 2  ;;  %p729_p11 = por %p105_p7, %p33_p0 }
   0xf   : > { %p733_p12 = por %p111_p8, %p39_p3  ;;  %s137_s26 = sand.u32 1, %s648_s14  }
  0x10   : > { %s838_s24 = scalar_select %p729_p11, 1, 0 }
  0x11   : > { %s839_s25 = scalar_select %p733_p12, 1, 0 }
  0x12   : > { %s490_s27 = sshll.u32 %s652_s15, 7  ;;  %s474_s28 = sshll.u32 %s137_s26, 3 }
  0x13   : > { %s742_s4 = scalar_lea.hbm %s830_s0, %s490_s27  ;;  %s141_s5 = scalar_lea.vmem [#allocation2], %s474_s28 }
  0x14   : > { %s149_s6 = sshll.u32 %s141_s5, 4  ;;  %p746_p13 = pnand %p518_p10, %p718_p5  ;;  %s750_s6 = int_to_ptr.vmem [resolvable:$true] %s149_s6 }
  0x15   : > { %s138_s8 = scalar_lea.sflag [#allocation3], %s137_s26  ;;  %s560_s9 = scalar_lea.hbm %s742_s4, 128 }
  0x16   : > { %p561_p2 = scmp.ne.s32.totalorder %s742_s4, %s560_s9  ;;  %p562_p3 = pneg %p746_p13 }
  0x17   : > { %s565_s17 = scalar_lea.hbm %s830_s0, 256  ;;  %p566_p5 = scmp.lt.s32.totalorder %s742_s4, %s830_s0 }
  0x18   : > { %p563_p4 = pnand %p562_p3, %p561_p2  ;;  %p567_p8 = scmp.lt.s32.totalorder %s565_s17, %s560_s9 }
  0x1a   : > { %p564_p7 = pneg %p563_p4  ;;  %p568_p10 = por %p567_p8, %p566_p5 }
  0x1c   : > { %p569_p9 = pnand %p568_p10, %p564_p7 }
  0x1e   : > { %572 = shalt.err (!%p569_p9)
}
  0x1f   : > { %s573_s22 = scalar_lea.vmem %s750_s6, 128  ;;  %s654_s26 = smov [#allocation2]  }
  0x20   : > { %p574_p0 = scmp.ne.s32.totalorder %s750_s6, %s573_s22  ;;  %s578_s27 = sshll.u32 %s654_s26, 4  ;;  %s579_s27 = int_to_ptr.vmem [resolvable:$false] %s578_s27 }
  0x21   : > { %s580_s28 = scalar_lea.vmem %s579_s27, 256  ;;  %p581_p4 = scmp.lt.s32.totalorder %s750_s6, %s579_s27 }
  0x22   : > { %p576_p1 = pnand %p574_p0, %p562_p3  ;;  %p582_p12 = scmp.lt.s32.totalorder %s580_s28, %s573_s22 }
  0x24   : > { %p577_p2 = pneg %p576_p1  ;;  %p583_p11 = por %p582_p12, %p581_p4 }
  0x26   : > { %p584_p6 = pnand %p583_p11, %p577_p2 }
  0x28   : > { %587 = shalt.err (!%p584_p6)
}
  0x29   : > { %513 = dma.hbm_to_vmem [thread:$0]  (!%p746_p13), %s742_s4, 128, %s750_s6, %s138_s8  }
  0x2a   : > { %p841_p9 = scmp.lt.s32.totalorder %s652_s15, 3  ;;  %p842_p7 = scmp.ge.s32.totalorder %s652_s15, 1 }
  0x2c   : > { %p155_p0 = pnand %p842_p7, %p841_p9 }
  0x2d   : > { %s777_s29 = sand.u32 (!%p155_p0), 1, %s644_s13   ;;  %p843_p6 = scmp.ne.s32.totalorder (!%p155_p0), %s837_s23, 0 }
  0x2e   : > { %158 = sbr.rel (%p155_p0) target bundleno = 754 (0x2f2), region = 32  ;;  %s478_s30 = sshll.u32 (!%p155_p0), %s777_s29, 3 }
  0x2f   : > { %s161_s5 = scalar_lea.sflag (!%p155_p0), [#allocation3], %s777_s29  ;;  %s164_s7 = scalar_lea.vmem (!%p155_p0), [#allocation2], %s478_s30 }
  0x33   : > { %631 = dma.done.wait (%p843_p6), %s161_s5, 128  }
  0x34   : > { %633 = vsyncadd (%p843_p6), %s161_s5, 4294967168  ;;  %vm191_vm0 = vcmask 1043456   ;;  %v187_v0 = vld [vmem:[%s164_s7] sm:$0xff]  ;;  %v655_v5 = vmov 0.0   ;;  %vm656_vm1 = vmmov 0   ;;  %v201_v7 = vlaneseq  ;;  %s491_s9 = sshll.u32 %s700_s16, 7 }
  0x35   : > { %v189_v1 = vcombine.high %v187_v0, %v187_v0  ;;  %v192_v2 = vsel %vm191_vm0, %v187_v0, 0.0  ;;  %496 = vmatprep.subr.mxu0 %v655_v5  ;;  %v198_v6 = vld [vmem:[%s831_s1] sm:$0xf]  ;;  %501 = vmatprep.subr.mxu1 %v655_v5  ;;  %vm207_vm2 = vcmask 31744   ;;  %vm288_vm3 = vcmask 1040384   ;;  %s186_s10 = scalar_lea.vmem [#allocation5], %s478_s30  ;;  %s399_s20 = scalar_lea.hbm %s833_s3, %s491_s9 }
  0x36   : > { %497 = vmatpush3.msk.msra.mxu0 %vm191_vm0, %v198_v6  ;;  %498 = vmatprep.mubr.msk.f32.mxu0 %vm656_vm1, %v655_v5  ;;  %v202_v8 = vand.u32 127, %v201_v7  ;;  %v204_v9 = vshrl.u32 %v201_v7, 7  ;;  %v199_v14 = vld [vmem:[%s832_s2] sm:$0x1]  ;;  %vm284_vm4 = vcmask 7168   ;;  %s401_s11 = sshll.u32 %s186_s10, 4  ;;  %s402_s11 = int_to_ptr.vmem [resolvable:$true] %s401_s11 }
  0x37   : > { %v193_v3 = vsel %vm191_vm0, %v189_v1, 0.0  ;;  %503 = vmatprep.mubr.msk.f32.mxu1 %vm656_vm1, %v655_v5  ;;  %502 = vmatpush3.msk.msra.mxu1 %vm288_vm3, %v199_v14  ;;  %v657_v26 = vmov 839922192   ;;  %s387_s22 = scalar_lea.sflag [#allocation4], %s777_s29  ;;  %s588_s26 = scalar_lea.vmem %s402_s11, 128 }
  0x38   : > { %v194_v4 = vadd.f32 %v193_v3, %v192_v2  ;;  %v205_v10 = vsub.s32 %v202_v8, %v204_v9  ;;  %v370_v23 = vsub.s32 0, %v204_v9  ;;  %v377_v27 = vunpack.c.l.s4 %v657_v26  ;;  %p589_p11 = scmp.ne.s32.totalorder %s402_s11, %s588_s26  ;;  %p844_p12 = scmp.ne.s32.totalorder %s838_s24, 0 }
  0x39   : > { %s658_s27 = smov [#allocation5]  }
  0x3a   : > { %195 = vadd.xlane.f32.xlu0 %v194_v4  ;;  %v378_v28 = vunpack.c.0.s8 %v377_v27  ;;  %p590_p13 = pnand %p589_p11, %p844_p12  ;;  %s592_s28 = sshll.u32 %s658_s27, 4  ;;  %s593_s28 = int_to_ptr.vmem [resolvable:$false] %s592_s28 }
  0x3b   : > { %s594_s16 = scalar_lea.vmem %s593_s28, 256  ;;  %p595_p3 = scmp.lt.s32.totalorder %s402_s11, %s593_s28 }
  0x3c   : > { %v381_v29 = vsub.s32 %v378_v28, %v204_v9  ;;  %p591_p1 = pneg %p590_p13  ;;  %p596_p5 = scmp.lt.s32.totalorder %s594_s16, %s588_s26 }
  0x3e   : > { %p597_p8 = por %p596_p5, %p595_p3 }
  0x40   : > { %p598_p10 = pnand %p597_p8, %p591_p1 }
  0xc3   : > { %v196_v11 = vpop.xlane.xlu0 %195 }
  0xc4   : > { %v197_v12 = vmul.f32 0.00390625, %v196_v11 }
  0xc6   : > { %v206_v13 = vrot.slane %v197_v12, %v205_v10 }
  0xc8   : > { %499 = vmatmul.mubr.msk.f32.vlgmr.msra.gmra.mxu0 %vm207_vm2, %v206_v13 }
 0x188   : > { %v279_v15 = vpop.f32.mrf.mxu0 }
 0x189   : > { %v283_v16 = vmax.f32 %v279_v15, 0.0 }
 0x18a   : > { %v500_v17 = vpop.f32.mrf.mxu0 }
 0x18b   : > { %504 = vmatmul.mubr.msk.f32.vlgmr.msra.gmra.mxu1 %vm284_vm4, %v283_v16 }
 0x24b   : > { %v358_v18 = vpop.f32.mrf.mxu1 }
 0x24c   : > { %v484_v19 = vmul.f32 -1.442695, %v358_v18 }
 0x24d   : > { %v505_v20 = vpop.f32.mrf.mxu1 }
 0x24e   : > { %556 = vpow2.f32 %v484_v19 }
 0x25b   : > { %v557_v21 = vpop.eup %556 }
 0x25c   : > { %v365_v22 = vadd.f32 1.0, %v557_v21 }
 0x25e   : > { %558 = vrcp.f32 %v365_v22 }
 0x26b   : > { %v559_v24 = vpop.eup %558 }
 0x26c   : > { %v371_v25 = vrot.slane %v559_v24, %v370_v23 }
 0x26e   : > { %373 = vbcast.lane.b32.xlu0 %v371_v25, 256 }
 0x2e0   : > { %v374_v30 = vpop.permute.xlu0 %373 }
 0x2e1   : > { %v382_v31 = vrot.slane %v374_v30, %v381_v29 }
 0x2e3   : > { %v384_v32 = vmul.f32 %v382_v31, %v187_v0 }
 0x2e5   : > { %385 = vst [vmem:[%s186_s10] sm:$0xff] %v384_v32 }
 0x2e6   : > { %601 = shalt.err (!%p598_p10)
}
 0x2e7   : > { %s602_s30 = scalar_lea.hbm %s399_s20, 128  ;;  %s606_s7 = scalar_lea.hbm %s833_s3, 256 }
 0x2e8   : > { %p603_p2 = scmp.ne.s32.totalorder %s399_s20, %s602_s30  ;;  %p607_p7 = scmp.lt.s32.totalorder %s399_s20, %s833_s3 }
 0x2e9   : > { %p608_p0 = scmp.lt.s32.totalorder %s606_s7, %s602_s30 }
 0x2ea   : > { %p604_p4 = pnand %p603_p2, %p844_p12 }
 0x2eb   : > { %p609_p6 = por %p608_p0, %p607_p7 }
 0x2ec   : > { %p605_p9 = pneg %p604_p4 }
 0x2ee   : > { %p610_p11 = pnand %p609_p6, %p605_p9 }
 0x2f0   : > { %613 = shalt.err (!%p610_p11)
}
 0x2f1   : > { %508 = dma.vmem_to_hbm [thread:$0]  (%p844_p12), %s402_s11, 128, %s399_s20, %s387_s22  }
 0x2f2 PF: > { %s413_s23 = sand.u32 1, %s640_s12   ;;  %p845_p13 = scmp.ne.s32.totalorder %s839_s25, 0 }
 0x2f3   : > { %p846_p1 = scmp.ge.s32.totalorder %s652_s15, 2  ;;  %s414_s8 = scalar_lea.sflag [#allocation4], %s413_s23 }
 0x2f5   : > { %p515_p3 = pnand %p846_p1, %p845_p13 }
 0x2f7   : > { %p516_p5 = pneg %p515_p3 }
 0x2f9   : > { %635 = dma.done.wait (%p516_p5), %s414_s8, 128  }
 0x2fa   : > { %637 = vsyncadd (%p516_p5), %s414_s8, 4294967168  ;;  %p16_p8 = scmp.ge.s32.totalorder %s704_s18, 4   ;;  %s847_s12 = smov %s644_s13 }
 0x2fb   : > { %s848_s13 = smov %s648_s14  ;;  %s849_s14 = smov %s716_s21 }
 0x2fc   : > { %s850_s15 = smov %s704_s18  ;;  %18 = sbr.rel (!%p16_p8) target bundleno = 5 (0x5), region = 77 }
 0x301   :  { %419 = vsyncpa [#allocation3], 1 }
 0x302   :  { %421 = vsyncpa [#allocation3 + $0x1], 1 }
 0x303   :  { %422 = vsyncpa [#allocation4], 1 }
 0x304   :  { %424 = vsyncpa [#allocation4 + $0x1], 1 }

</bundles_post_ra>
